<compile_context>
chip_gen: v7x
topology: tpu7x:2x2x1
jax: 0.10.0
libtpu: 0.0.40
codegen_flags: <defaults>
</compile_context>

<pallas_src>
import functools

import jax
import jax.numpy as jnp
from jax.experimental import pallas as pl
from jax.experimental.pallas import tpu as pltpu

INPUT_SIZE = 28
HIDDEN = 64
NUM_CLASSES = 10
OUT_PAD = 128  # lane-dense padded output width


def _lstm_linear_kernel(x_ref, w_ih_ref, w_hh_ref, b_ref,
                        w_out_ref, b_out_ref, out_ref, xw_ref, *, T, B, H):
    # ---- Hoisted input projection: one matmul for every time-step + bias ----
    # (T*B, I) @ (I, 4H) -> (T*B, 4H), spilled to VMEM scratch so the unrolled
    # recurrence does not keep T*B rows live in vregs.
    xw_ref[...] = (jnp.dot(x_ref[...], w_ih_ref[...],
                           preferred_element_type=jnp.float32)
                   + b_ref[...])

    w_hh = w_hh_ref[...]                                   # (H, 4H), resident

    h = jnp.zeros((B, H), jnp.float32)
    c = jnp.zeros((B, H), jnp.float32)

    # ---- Fully unrolled recurrence (T static & small) ----
    # Per-step critical path: one (B,H)@(H,4H) matmul + ONE sigmoid pass + one
    # tanh(c).  g-block pre-activations were pre-scaled by 2 in the wrapper, so
    # tanh(g) = 2*sigmoid(2g) - 1 (exact identity), recovered with a VPU fma.
    for t in range(T):
        gates = (xw_ref[pl.ds(t * B, B), :]
                 + jnp.dot(h, w_hh, preferred_element_type=jnp.float32))
        s_all = jax.nn.sigmoid(gates)                      # single EUP pass
        i_g = s_all[:, 0 * H:1 * H]
        f_g = s_all[:, 1 * H:2 * H]
        g_g = 2.0 * s_all[:, 2 * H:3 * H] - 1.0            # == tanh(pre-act)
        o_g = s_all[:, 3 * H:4 * H]
        c = f_g * c + i_g * g_g
        h = o_g * jnp.tanh(c)

    # ---- Final Linear on the last hidden state (lane-dense 128-col store) ---
    out_ref[...] = (jnp.dot(h, w_out_ref[...],
                            preferred_element_type=jnp.float32)
                    + b_out_ref[...])


def _prepare_params(params):
    """Fold the 2x g-block scale and pad the output weights lane-dense."""
    w_ih_T, w_hh_T, b, w_out_T, b_out = params
    gsl = slice(2 * HIDDEN, 3 * HIDDEN)
    # Scale ONLY the g-block columns, in ALL THREE of W_ih, W_hh and b.
    w_ih_s = w_ih_T.at[:, gsl].multiply(2.0)
    w_hh_s = w_hh_T.at[:, gsl].multiply(2.0)
    b_s = b.at[:, gsl].multiply(2.0)
    # Zero-pad the head to 128 output columns (unmasked vst; MXU N is padded
    # to 128 anyway, so the extra columns are free compute).
    w_out_p = jnp.zeros((HIDDEN, OUT_PAD), jnp.float32)
    w_out_p = w_out_p.at[:, :NUM_CLASSES].set(w_out_T)
    b_out_p = jnp.zeros((1, OUT_PAD), jnp.float32)
    b_out_p = b_out_p.at[:, :NUM_CLASSES].set(b_out)
    return w_ih_s, w_hh_s, b_s, w_out_p, b_out_p


def rnn_forward(x_btI, params):
    """x_btI: (B, T, INPUT_SIZE) float32 -> (B, 10) float32."""
    w_ih_s, w_hh_s, b_s, w_out_p, b_out_p = _prepare_params(params)
    B, T, I = x_btI.shape
    # Layout plumbing: time-major, flattened to one lane-dense 2-D slab feeding
    # the hoisted input-projection matmul.
    x_2d = jnp.transpose(x_btI, (1, 0, 2)).reshape(T * B, I).astype(jnp.float32)

    full = lambda shape: pl.BlockSpec(shape, lambda: (0,) * len(shape))
    kernel = functools.partial(_lstm_linear_kernel, T=T, B=B, H=HIDDEN)

    # NOTE: for large B, tile the batch with grid=(B//TB,) and
    # dimension_semantics=("parallel",) to use both v7x TensorCores and enable
    # double-buffered x tiles; at this size a grid-less call is lower overhead.
    out_padded = pl.pallas_call(
        kernel,
        out_shape=jax.ShapeDtypeStruct((B, OUT_PAD), jnp.float32),
        in_specs=[
            full((T * B, I)),
            full(w_ih_s.shape),
            full(w_hh_s.shape),
            full(b_s.shape),
            full(w_out_p.shape),
            full(b_out_p.shape),
        ],
        out_specs=full((B, OUT_PAD)),
        scratch_shapes=[pltpu.VMEM((T * B, 4 * HIDDEN), jnp.float32)],
        compiler_params=pltpu.CompilerParams(vmem_limit_bytes=8 << 20),
    )(x_2d, w_ih_s, w_hh_s, b_s, w_out_p, b_out_p)
    return out_padded[:, :NUM_CLASSES]


def init_params(key):
    """Deterministic params matching PyTorch nn.LSTM(28,64)+nn.Linear(64,10)."""
    ks = jax.random.split(key, 6)
    bound_l = 1.0 / jnp.sqrt(HIDDEN)
    # PyTorch weight_ih_l0: (4H, I); stored transposed for x @ W^T.
    w_ih_T = jax.random.uniform(ks[0], (INPUT_SIZE, 4 * HIDDEN),
                                jnp.float32, -bound_l, bound_l)
    w_hh_T = jax.random.uniform(ks[1], (HIDDEN, 4 * HIDDEN),
                                jnp.float32, -bound_l, bound_l)
    b_ih = jax.random.uniform(ks[2], (4 * HIDDEN,), jnp.float32,
                              -bound_l, bound_l)
    b_hh = jax.random.uniform(ks[3], (4 * HIDDEN,), jnp.float32,
                              -bound_l, bound_l)
    b = (b_ih + b_hh).reshape(1, 4 * HIDDEN)
    bound_o = 1.0 / jnp.sqrt(HIDDEN)
    w_out_T = jax.random.uniform(ks[4], (HIDDEN, NUM_CLASSES), jnp.float32,
                                 -bound_o, bound_o)
    b_out = jax.random.uniform(ks[5], (NUM_CLASSES,), jnp.float32,
                               -bound_o, bound_o).reshape(1, NUM_CLASSES)
    return (w_ih_T, w_hh_T, b, w_out_T, b_out)


def rnn_reference(x_btI, params):
    """Pure-JAX reference (same math as PyTorch LSTM [i,f,g,o] + Linear)."""
    w_ih_T, w_hh_T, b, w_out_T, b_out = params
    B, T, _ = x_btI.shape
    h = jnp.zeros((B, HIDDEN), jnp.float32)
    c = jnp.zeros((B, HIDDEN), jnp.float32)
    for t in range(T):
        gates = x_btI[:, t, :] @ w_ih_T + h @ w_hh_T + b
        i_g = jax.nn.sigmoid(gates[:, 0 * HIDDEN:1 * HIDDEN])
        f_g = jax.nn.sigmoid(gates[:, 1 * HIDDEN:2 * HIDDEN])
        g_g = jnp.tanh(gates[:, 2 * HIDDEN:3 * HIDDEN])
        o_g = jax.nn.sigmoid(gates[:, 3 * HIDDEN:4 * HIDDEN])
        c = f_g * c + i_g * g_g
        h = o_g * jnp.tanh(c)
    return h @ w_out_T + b_out


if __name__ == "__main__":
    key = jax.random.PRNGKey(0)
    k_x, k_p = jax.random.split(key)

    B, T = 8, 8                      # B multiple of 8 (sublane-aligned); I=28
    x = jax.random.normal(k_x, (B, T, INPUT_SIZE), jnp.float32)
    params = init_params(k_p)

    out = rnn_forward(x, params)
    out = jax.block_until_ready(out)

    ref = rnn_reference(x, params)
    assert out.shape == (B, NUM_CLASSES)
    assert jnp.allclose(out, ref, rtol=1e-4, atol=1e-4), "mismatch vs reference"

    print("KERNEL_OK")
</pallas_src>

<mosaic_0001>
module attributes {stable_mosaic.version = 11 : i64} {
  func.func @_lstm_linear_kernel(%arg0: memref<64x28xf32, #tpu.memory_space<vmem>>, %arg1: memref<28x256xf32, #tpu.memory_space<vmem>>, %arg2: memref<64x256xf32, #tpu.memory_space<vmem>>, %arg3: memref<1x256xf32, #tpu.memory_space<vmem>>, %arg4: memref<64x128xf32, #tpu.memory_space<vmem>>, %arg5: memref<1x128xf32, #tpu.memory_space<vmem>>, %arg6: memref<8x128xf32, #tpu.memory_space<vmem>>, %arg7: memref<64x256xf32, #tpu.memory_space<vmem>>) attributes {dimension_semantics = [], scalar_prefetch = 0 : i64, scratch_operands = 1 : i64, tpu.core_type = #tpu.core_type<tc>} {
    %c0 = arith.constant 0 : index
    %c0_0 = arith.constant 0 : index
    %0 = vector.load %arg0[%c0, %c0_0] : memref<64x28xf32, #tpu.memory_space<vmem>>, vector<64x28xf32>
    %c0_1 = arith.constant 0 : index
    %c0_2 = arith.constant 0 : index
    %1 = vector.load %arg1[%c0_1, %c0_2] : memref<28x256xf32, #tpu.memory_space<vmem>>, vector<28x256xf32>
    %cst = arith.constant dense<0.000000e+00> : vector<64x256xf32>
    %2 = tpu.matmul %0, %1, %cst {dimension_numbers = #tpu.dot_dimension_numbers<[1], [0], [0], [1], [0, 0, 1, 1], [], []>} : vector<64x28xf32>, vector<28x256xf32>, vector<64x256xf32> -> vector<64x256xf32>
    %c0_3 = arith.constant 0 : index
    %c0_4 = arith.constant 0 : index
    %3 = vector.load %arg3[%c0_3, %c0_4] : memref<1x256xf32, #tpu.memory_space<vmem>>, vector<1x256xf32>
    %4 = vector.broadcast %3 : vector<1x256xf32> to vector<64x256xf32>
    %5 = arith.addf %2, %4 : vector<64x256xf32>
    %c0_5 = arith.constant 0 : index
    %c0_6 = arith.constant 0 : index
    %6 = vector.load %arg7[%c0_5, %c0_6] : memref<64x256xf32, #tpu.memory_space<vmem>>, vector<64x256xf32>
    tpu.vector_store %arg7[%c0_5, %c0_6], %5 {strides = array<i32>} : memref<64x256xf32, #tpu.memory_space<vmem>>, vector<64x256xf32>,
    %c0_7 = arith.constant 0 : index
    %c0_8 = arith.constant 0 : index
    %7 = vector.load %arg2[%c0_7, %c0_8] : memref<64x256xf32, #tpu.memory_space<vmem>>, vector<64x256xf32>
    %cst_9 = arith.constant 0.000000e+00 : f32
    %8 = vector.broadcast %cst_9 : f32 to vector<8x64xf32>
    %cst_10 = arith.constant 0.000000e+00 : f32
    %9 = vector.broadcast %cst_10 : f32 to vector<8x64xf32>
    %c0_11 = arith.constant 0 : index
    %c0_12 = arith.constant 0 : index
    %10 = vector.load %arg7[%c0_11, %c0_12] : memref<64x256xf32, #tpu.memory_space<vmem>>, vector<8x256xf32>
    %cst_13 = arith.constant dense<0.000000e+00> : vector<8x256xf32>
    %11 = tpu.matmul %8, %7, %cst_13 {dimension_numbers = #tpu.dot_dimension_numbers<[1], [0], [0], [1], [0, 0, 1, 1], [], []>} : vector<8x64xf32>, vector<64x256xf32>, vector<8x256xf32> -> vector<8x256xf32>
    %12 = arith.addf %10, %11 : vector<8x256xf32>
    %13 = arith.negf %12 : vector<8x256xf32>
    %14 = math.exp %13 : vector<8x256xf32>
    %cst_14 = arith.constant 1.000000e+00 : f32
    %15 = vector.broadcast %cst_14 : f32 to vector<8x256xf32>
    %16 = arith.addf %15, %14 : vector<8x256xf32>
    %17 = arith.divf %15, %16 : vector<8x256xf32>
    %18 = vector.extract_strided_slice %17 {offsets = [0, 0], sizes = [8, 64], strides = [1, 1]} : vector<8x256xf32> to vector<8x64xf32>
    %19 = vector.extract_strided_slice %17 {offsets = [0, 64], sizes = [8, 64], strides = [1, 1]} : vector<8x256xf32> to vector<8x64xf32>
    %20 = vector.extract_strided_slice %17 {offsets = [0, 128], sizes = [8, 64], strides = [1, 1]} : vector<8x256xf32> to vector<8x64xf32>
    %cst_15 = arith.constant 2.000000e+00 : f32
    %21 = vector.broadcast %cst_15 : f32 to vector<8x64xf32>
    %22 = arith.mulf %21, %20 : vector<8x64xf32>
    %cst_16 = arith.constant 1.000000e+00 : f32
    %23 = vector.broadcast %cst_16 : f32 to vector<8x64xf32>
    %24 = arith.subf %22, %23 : vector<8x64xf32>
    %25 = vector.extract_strided_slice %17 {offsets = [0, 192], sizes = [8, 64], strides = [1, 1]} : vector<8x256xf32> to vector<8x64xf32>
    %26 = arith.mulf %19, %9 : vector<8x64xf32>
    %27 = arith.mulf %18, %24 : vector<8x64xf32>
    %28 = arith.addf %26, %27 : vector<8x64xf32>
    %29 = math.tanh %28 : vector<8x64xf32>
    %30 = arith.mulf %25, %29 : vector<8x64xf32>
    %c8 = arith.constant 8 : index
    %c0_17 = arith.constant 0 : index
    %31 = vector.load %arg7[%c8, %c0_17] : memref<64x256xf32, #tpu.memory_space<vmem>>, vector<8x256xf32>
    %cst_18 = arith.constant dense<0.000000e+00> : vector<8x256xf32>
    %32 = tpu.matmul %30, %7, %cst_18 {dimension_numbers = #tpu.dot_dimension_numbers<[1], [0], [0], [1], [0, 0, 1, 1], [], []>} : vector<8x64xf32>, vector<64x256xf32>, vector<8x256xf32> -> vector<8x256xf32>
    %33 = arith.addf %31, %32 : vector<8x256xf32>
    %34 = arith.negf %33 : vector<8x256xf32>
    %35 = math.exp %34 : vector<8x256xf32>
    %cst_19 = arith.constant 1.000000e+00 : f32
    %36 = vector.broadcast %cst_19 : f32 to vector<8x256xf32>
    %37 = arith.addf %36, %35 : vector<8x256xf32>
    %38 = arith.divf %36, %37 : vector<8x256xf32>
    %39 = vector.extract_strided_slice %38 {offsets = [0, 0], sizes = [8, 64], strides = [1, 1]} : vector<8x256xf32> to vector<8x64xf32>
    %40 = vector.extract_strided_slice %38 {offsets = [0, 64], sizes = [8, 64], strides = [1, 1]} : vector<8x256xf32> to vector<8x64xf32>
    %41 = vector.extract_strided_slice %38 {offsets = [0, 128], sizes = [8, 64], strides = [1, 1]} : vector<8x256xf32> to vector<8x64xf32>
    %cst_20 = arith.constant 2.000000e+00 : f32
    %42 = vector.broadcast %cst_20 : f32 to vector<8x64xf32>
    %43 = arith.mulf %42, %41 : vector<8x64xf32>
    %cst_21 = arith.constant 1.000000e+00 : f32
    %44 = vector.broadcast %cst_21 : f32 to vector<8x64xf32>
    %45 = arith.subf %43, %44 : vector<8x64xf32>
    %46 = vector.extract_strided_slice %38 {offsets = [0, 192], sizes = [8, 64], strides = [1, 1]} : vector<8x256xf32> to vector<8x64xf32>
    %47 = arith.mulf %40, %28 : vector<8x64xf32>
    %48 = arith.mulf %39, %45 : vector<8x64xf32>
    %49 = arith.addf %47, %48 : vector<8x64xf32>
    %50 = math.tanh %49 : vector<8x64xf32>
    %51 = arith.mulf %46, %50 : vector<8x64xf32>
    %c16 = arith.constant 16 : index
    %c0_22 = arith.constant 0 : index
    %52 = vector.load %arg7[%c16, %c0_22] : memref<64x256xf32, #tpu.memory_space<vmem>>, vector<8x256xf32>
    %cst_23 = arith.constant dense<0.000000e+00> : vector<8x256xf32>
    %53 = tpu.matmul %51, %7, %cst_23 {dimension_numbers = #tpu.dot_dimension_numbers<[1], [0], [0], [1], [0, 0, 1, 1], [], []>} : vector<8x64xf32>, vector<64x256xf32>, vector<8x256xf32> -> vector<8x256xf32>
    %54 = arith.addf %52, %53 : vector<8x256xf32>
    %55 = arith.negf %54 : vector<8x256xf32>
    %56 = math.exp %55 : vector<8x256xf32>
    %cst_24 = arith.constant 1.000000e+00 : f32
    %57 = vector.broadcast %cst_24 : f32 to vector<8x256xf32>
    %58 = arith.addf %57, %56 : vector<8x256xf32>
    %59 = arith.divf %57, %58 : vector<8x256xf32>
    %60 = vector.extract_strided_slice %59 {offsets = [0, 0], sizes = [8, 64], strides = [1, 1]} : vector<8x256xf32> to vector<8x64xf32>
    %61 = vector.extract_strided_slice %59 {offsets = [0, 64], sizes = [8, 64], strides = [1, 1]} : vector<8x256xf32> to vector<8x64xf32>
    %62 = vector.extract_strided_slice %59 {offsets = [0, 128], sizes = [8, 64], strides = [1, 1]} : vector<8x256xf32> to vector<8x64xf32>
    %cst_25 = arith.constant 2.000000e+00 : f32
    %63 = vector.broadcast %cst_25 : f32 to vector<8x64xf32>
    %64 = arith.mulf %63, %62 : vector<8x64xf32>
    %cst_26 = arith.constant 1.000000e+00 : f32
    %65 = vector.broadcast %cst_26 : f32 to vector<8x64xf32>
    %66 = arith.subf %64, %65 : vector<8x64xf32>
    %67 = vector.extract_strided_slice %59 {offsets = [0, 192], sizes = [8, 64], strides = [1, 1]} : vector<8x256xf32> to vector<8x64xf32>
    %68 = arith.mulf %61, %49 : vector<8x64xf32>
    %69 = arith.mulf %60, %66 : vector<8x64xf32>
    %70 = arith.addf %68, %69 : vector<8x64xf32>
    %71 = math.tanh %70 : vector<8x64xf32>
    %72 = arith.mulf %67, %71 : vector<8x64xf32>
    %c24 = arith.constant 24 : index
    %c0_27 = arith.constant 0 : index
    %73 = vector.load %arg7[%c24, %c0_27] : memref<64x256xf32, #tpu.memory_space<vmem>>, vector<8x256xf32>
    %cst_28 = arith.constant dense<0.000000e+00> : vector<8x256xf32>
    %74 = tpu.matmul %72, %7, %cst_28 {dimension_numbers = #tpu.dot_dimension_numbers<[1], [0], [0], [1], [0, 0, 1, 1], [], []>} : vector<8x64xf32>, vector<64x256xf32>, vector<8x256xf32> -> vector<8x256xf32>
    %75 = arith.addf %73, %74 : vector<8x256xf32>
    %76 = arith.negf %75 : vector<8x256xf32>
    %77 = math.exp %76 : vector<8x256xf32>
    %cst_29 = arith.constant 1.000000e+00 : f32
    %78 = vector.broadcast %cst_29 : f32 to vector<8x256xf32>
    %79 = arith.addf %78, %77 : vector<8x256xf32>
    %80 = arith.divf %78, %79 : vector<8x256xf32>
    %81 = vector.extract_strided_slice %80 {offsets = [0, 0], sizes = [8, 64], strides = [1, 1]} : vector<8x256xf32> to vector<8x64xf32>
    %82 = vector.extract_strided_slice %80 {offsets = [0, 64], sizes = [8, 64], strides = [1, 1]} : vector<8x256xf32> to vector<8x64xf32>
    %83 = vector.extract_strided_slice %80 {offsets = [0, 128], sizes = [8, 64], strides = [1, 1]} : vector<8x256xf32> to vector<8x64xf32>
    %cst_30 = arith.constant 2.000000e+00 : f32
    %84 = vector.broadcast %cst_30 : f32 to vector<8x64xf32>
    %85 = arith.mulf %84, %83 : vector<8x64xf32>
    %cst_31 = arith.constant 1.000000e+00 : f32
    %86 = vector.broadcast %cst_31 : f32 to vector<8x64xf32>
    %87 = arith.subf %85, %86 : vector<8x64xf32>
    %88 = vector.extract_strided_slice %80 {offsets = [0, 192], sizes = [8, 64], strides = [1, 1]} : vector<8x256xf32> to vector<8x64xf32>
    %89 = arith.mulf %82, %70 : vector<8x64xf32>
    %90 = arith.mulf %81, %87 : vector<8x64xf32>
    %91 = arith.addf %89, %90 : vector<8x64xf32>
    %92 = math.tanh %91 : vector<8x64xf32>
    %93 = arith.mulf %88, %92 : vector<8x64xf32>
    %c32 = arith.constant 32 : index
    %c0_32 = arith.constant 0 : index
    %94 = vector.load %arg7[%c32, %c0_32] : memref<64x256xf32, #tpu.memory_space<vmem>>, vector<8x256xf32>
    %cst_33 = arith.constant dense<0.000000e+00> : vector<8x256xf32>
    %95 = tpu.matmul %93, %7, %cst_33 {dimension_numbers = #tpu.dot_dimension_numbers<[1], [0], [0], [1], [0, 0, 1, 1], [], []>} : vector<8x64xf32>, vector<64x256xf32>, vector<8x256xf32> -> vector<8x256xf32>
    %96 = arith.addf %94, %95 : vector<8x256xf32>
    %97 = arith.negf %96 : vector<8x256xf32>
    %98 = math.exp %97 : vector<8x256xf32>
    %cst_34 = arith.constant 1.000000e+00 : f32
    %99 = vector.broadcast %cst_34 : f32 to vector<8x256xf32>
    %100 = arith.addf %99, %98 : vector<8x256xf32>
    %101 = arith.divf %99, %100 : vector<8x256xf32>
    %102 = vector.extract_strided_slice %101 {offsets = [0, 0], sizes = [8, 64], strides = [1, 1]} : vector<8x256xf32> to vector<8x64xf32>
    %103 = vector.extract_strided_slice %101 {offsets = [0, 64], sizes = [8, 64], strides = [1, 1]} : vector<8x256xf32> to vector<8x64xf32>
    %104 = vector.extract_strided_slice %101 {offsets = [0, 128], sizes = [8, 64], strides = [1, 1]} : vector<8x256xf32> to vector<8x64xf32>
    %cst_35 = arith.constant 2.000000e+00 : f32
    %105 = vector.broadcast %cst_35 : f32 to vector<8x64xf32>
    %106 = arith.mulf %105, %104 : vector<8x64xf32>
    %cst_36 = arith.constant 1.000000e+00 : f32
    %107 = vector.broadcast %cst_36 : f32 to vector<8x64xf32>
    %108 = arith.subf %106, %107 : vector<8x64xf32>
    %109 = vector.extract_strided_slice %101 {offsets = [0, 192], sizes = [8, 64], strides = [1, 1]} : vector<8x256xf32> to vector<8x64xf32>
    %110 = arith.mulf %103, %91 : vector<8x64xf32>
    %111 = arith.mulf %102, %108 : vector<8x64xf32>
    %112 = arith.addf %110, %111 : vector<8x64xf32>
    %113 = math.tanh %112 : vector<8x64xf32>
    %114 = arith.mulf %109, %113 : vector<8x64xf32>
    %c40 = arith.constant 40 : index
    %c0_37 = arith.constant 0 : index
    %115 = vector.load %arg7[%c40, %c0_37] : memref<64x256xf32, #tpu.memory_space<vmem>>, vector<8x256xf32>
    %cst_38 = arith.constant dense<0.000000e+00> : vector<8x256xf32>
    %116 = tpu.matmul %114, %7, %cst_38 {dimension_numbers = #tpu.dot_dimension_numbers<[1], [0], [0], [1], [0, 0, 1, 1], [], []>} : vector<8x64xf32>, vector<64x256xf32>, vector<8x256xf32> -> vector<8x256xf32>
    %117 = arith.addf %115, %116 : vector<8x256xf32>
    %118 = arith.negf %117 : vector<8x256xf32>
    %119 = math.exp %118 : vector<8x256xf32>
    %cst_39 = arith.constant 1.000000e+00 : f32
    %120 = vector.broadcast %cst_39 : f32 to vector<8x256xf32>
    %121 = arith.addf %120, %119 : vector<8x256xf32>
    %122 = arith.divf %120, %121 : vector<8x256xf32>
    %123 = vector.extract_strided_slice %122 {offsets = [0, 0], sizes = [8, 64], strides = [1, 1]} : vector<8x256xf32> to vector<8x64xf32>
    %124 = vector.extract_strided_slice %122 {offsets = [0, 64], sizes = [8, 64], strides = [1, 1]} : vector<8x256xf32> to vector<8x64xf32>
    %125 = vector.extract_strided_slice %122 {offsets = [0, 128], sizes = [8, 64], strides = [1, 1]} : vector<8x256xf32> to vector<8x64xf32>
    %cst_40 = arith.constant 2.000000e+00 : f32
    %126 = vector.broadcast %cst_40 : f32 to vector<8x64xf32>
    %127 = arith.mulf %126, %125 : vector<8x64xf32>
    %cst_41 = arith.constant 1.000000e+00 : f32
    %128 = vector.broadcast %cst_41 : f32 to vector<8x64xf32>
    %129 = arith.subf %127, %128 : vector<8x64xf32>
    %130 = vector.extract_strided_slice %122 {offsets = [0, 192], sizes = [8, 64], strides = [1, 1]} : vector<8x256xf32> to vector<8x64xf32>
    %131 = arith.mulf %124, %112 : vector<8x64xf32>
    %132 = arith.mulf %123, %129 : vector<8x64xf32>
    %133 = arith.addf %131, %132 : vector<8x64xf32>
    %134 = math.tanh %133 : vector<8x64xf32>
    %135 = arith.mulf %130, %134 : vector<8x64xf32>
    %c48 = arith.constant 48 : index
    %c0_42 = arith.constant 0 : index
    %136 = vector.load %arg7[%c48, %c0_42] : memref<64x256xf32, #tpu.memory_space<vmem>>, vector<8x256xf32>
    %cst_43 = arith.constant dense<0.000000e+00> : vector<8x256xf32>
    %137 = tpu.matmul %135, %7, %cst_43 {dimension_numbers = #tpu.dot_dimension_numbers<[1], [0], [0], [1], [0, 0, 1, 1], [], []>} : vector<8x64xf32>, vector<64x256xf32>, vector<8x256xf32> -> vector<8x256xf32>
    %138 = arith.addf %136, %137 : vector<8x256xf32>
    %139 = arith.negf %138 : vector<8x256xf32>
    %140 = math.exp %139 : vector<8x256xf32>
    %cst_44 = arith.constant 1.000000e+00 : f32
    %141 = vector.broadcast %cst_44 : f32 to vector<8x256xf32>
    %142 = arith.addf %141, %140 : vector<8x256xf32>
    %143 = arith.divf %141, %142 : vector<8x256xf32>
    %144 = vector.extract_strided_slice %143 {offsets = [0, 0], sizes = [8, 64], strides = [1, 1]} : vector<8x256xf32> to vector<8x64xf32>
    %145 = vector.extract_strided_slice %143 {offsets = [0, 64], sizes = [8, 64], strides = [1, 1]} : vector<8x256xf32> to vector<8x64xf32>
    %146 = vector.extract_strided_slice %143 {offsets = [0, 128], sizes = [8, 64], strides = [1, 1]} : vector<8x256xf32> to vector<8x64xf32>
    %cst_45 = arith.constant 2.000000e+00 : f32
    %147 = vector.broadcast %cst_45 : f32 to vector<8x64xf32>
    %148 = arith.mulf %147, %146 : vector<8x64xf32>
    %cst_46 = arith.constant 1.000000e+00 : f32
    %149 = vector.broadcast %cst_46 : f32 to vector<8x64xf32>
    %150 = arith.subf %148, %149 : vector<8x64xf32>
    %151 = vector.extract_strided_slice %143 {offsets = [0, 192], sizes = [8, 64], strides = [1, 1]} : vector<8x256xf32> to vector<8x64xf32>
    %152 = arith.mulf %145, %133 : vector<8x64xf32>
    %153 = arith.mulf %144, %150 : vector<8x64xf32>
    %154 = arith.addf %152, %153 : vector<8x64xf32>
    %155 = math.tanh %154 : vector<8x64xf32>
    %156 = arith.mulf %151, %155 : vector<8x64xf32>
    %c56 = arith.constant 56 : index
    %c0_47 = arith.constant 0 : index
    %157 = vector.load %arg7[%c56, %c0_47] : memref<64x256xf32, #tpu.memory_space<vmem>>, vector<8x256xf32>
    %cst_48 = arith.constant dense<0.000000e+00> : vector<8x256xf32>
    %158 = tpu.matmul %156, %7, %cst_48 {dimension_numbers = #tpu.dot_dimension_numbers<[1], [0], [0], [1], [0, 0, 1, 1], [], []>} : vector<8x64xf32>, vector<64x256xf32>, vector<8x256xf32> -> vector<8x256xf32>
    %159 = arith.addf %157, %158 : vector<8x256xf32>
    %160 = arith.negf %159 : vector<8x256xf32>
    %161 = math.exp %160 : vector<8x256xf32>
    %cst_49 = arith.constant 1.000000e+00 : f32
    %162 = vector.broadcast %cst_49 : f32 to vector<8x256xf32>
    %163 = arith.addf %162, %161 : vector<8x256xf32>
    %164 = arith.divf %162, %163 : vector<8x256xf32>
    %165 = vector.extract_strided_slice %164 {offsets = [0, 0], sizes = [8, 64], strides = [1, 1]} : vector<8x256xf32> to vector<8x64xf32>
    %166 = vector.extract_strided_slice %164 {offsets = [0, 64], sizes = [8, 64], strides = [1, 1]} : vector<8x256xf32> to vector<8x64xf32>
    %167 = vector.extract_strided_slice %164 {offsets = [0, 128], sizes = [8, 64], strides = [1, 1]} : vector<8x256xf32> to vector<8x64xf32>
    %cst_50 = arith.constant 2.000000e+00 : f32
    %168 = vector.broadcast %cst_50 : f32 to vector<8x64xf32>
    %169 = arith.mulf %168, %167 : vector<8x64xf32>
    %cst_51 = arith.constant 1.000000e+00 : f32
    %170 = vector.broadcast %cst_51 : f32 to vector<8x64xf32>
    %171 = arith.subf %169, %170 : vector<8x64xf32>
    %172 = vector.extract_strided_slice %164 {offsets = [0, 192], sizes = [8, 64], strides = [1, 1]} : vector<8x256xf32> to vector<8x64xf32>
    %173 = arith.mulf %166, %154 : vector<8x64xf32>
    %174 = arith.mulf %165, %171 : vector<8x64xf32>
    %175 = arith.addf %173, %174 : vector<8x64xf32>
    %176 = math.tanh %175 : vector<8x64xf32>
    %177 = arith.mulf %172, %176 : vector<8x64xf32>
    %c0_52 = arith.constant 0 : index
    %c0_53 = arith.constant 0 : index
    %178 = vector.load %arg4[%c0_52, %c0_53] : memref<64x128xf32, #tpu.memory_space<vmem>>, vector<64x128xf32>
    %cst_54 = arith.constant dense<0.000000e+00> : vector<8x128xf32>
    %179 = tpu.matmul %177, %178, %cst_54 {dimension_numbers = #tpu.dot_dimension_numbers<[1], [0], [0], [1], [0, 0, 1, 1], [], []>} : vector<8x64xf32>, vector<64x128xf32>, vector<8x128xf32> -> vector<8x128xf32>
    %c0_55 = arith.constant 0 : index
    %c0_56 = arith.constant 0 : index
    %180 = vector.load %arg5[%c0_55, %c0_56] : memref<1x128xf32, #tpu.memory_space<vmem>>, vector<1x128xf32>
    %181 = vector.broadcast %180 : vector<1x128xf32> to vector<8x128xf32>
    %182 = arith.addf %179, %181 : vector<8x128xf32>
    %c0_57 = arith.constant 0 : index
    %c0_58 = arith.constant 0 : index
    %183 = vector.load %arg6[%c0_57, %c0_58] : memref<8x128xf32, #tpu.memory_space<vmem>>, vector<8x128xf32>
    tpu.vector_store %arg6[%c0_57, %c0_58], %182 {strides = array<i32>} : memref<8x128xf32, #tpu.memory_space<vmem>>, vector<8x128xf32>,
    return
  }
}

</mosaic_0001>

<bundles_post_ra>
// kernel: tpu_custom_call.1
= control target key start
LH: loop header
LB: loop body
LE: loop exit
PB: predicated region body
PF: predicated region fallthrough
CT: control target
= control target key end

     0   :  { %11 = vsyncpa [#allocation4], 0  ;;  %s1929_s0 = inlined_call_operand.vmem [shape: f32[64,28], index: 0, kind: input, shape index: {}]   ;;  %s1930_s1 = inlined_call_operand.vmem [shape: f32[28,256], index: 1, kind: input, shape index: {}]   ;;  %s1931_s2 = inlined_call_operand.hbm [shape: f32[64,256], index: 2, kind: input, shape index: {}]   ;;  %s1932_s3 = inlined_call_operand.vmem [shape: f32[1,256], index: 3, kind: input, shape index: {}]   ;;  %s1933_s4 = inlined_call_operand.hbm [shape: f32[64,128], index: 4, kind: input, shape index: {}]   ;;  %s1934_s5 = inlined_call_operand.vmem [shape: f32[1,128], index: 5, kind: input, shape index: {}]   ;;  %s1935_s6 = inlined_call_operand.hbm [shape: f32[8,128], index: 6, kind: output, shape index: {}]  }
   0x1   :  { %12 = vsyncpa [#allocation7], 0 }
   0x2   :  { %13 = vsyncpa [#allocation5], 0  ;;  %s1604_s21 = smov [#allocation3]   ;;  %s1532_s25 = scalar_lea.hbm %s1931_s2, 2048 }
   0x3   :  { %s23_s22 = sshll.u32 %s1604_s21, 4  ;;  %p1533_p0 = scmp.ne.s32.totalorder %s1931_s2, %s1532_s25  ;;  %s24_s22 = int_to_ptr.vmem [resolvable:$true] %s23_s22 }
   0x4   :  { %p1536_p1 = scmp.lt.u32.totalorder %s1532_s25, %s1931_s2 }
   0x6   :  { %p1538_p2 = pnand %p1536_p1, %p1533_p0 }
   0x8   :  { %1541 = shalt.err (!%p1538_p2)
}
   0x9   :  { %s1542_s30 = scalar_lea.vmem %s24_s22, 2048  ;;  %p1547_p4 = scmp.lt.s32.totalorder %s24_s22, %s24_s22 }
   0xa   :  { %p1543_p3 = scmp.ne.s32.totalorder %s24_s22, %s1542_s30  ;;  %p1548_p5 = scmp.lt.s32.totalorder %s1542_s30, %s1542_s30 }
   0xc   :  { %p1549_p6 = por %p1548_p5, %p1547_p4 }
   0xe   :  { %p1550_p7 = pnand %p1549_p6, %p1543_p3 }
  0x10   :  { %1553 = shalt.err (!%p1550_p7)
}
  0x11   :  { %s1605_s7 = smov 256   ;;  %s1606_s8 = smov 16  }
  0x12   :  { %29 = dma.hbm_to_vmem [thread:$0]  %s1931_s2, 2048, %s24_s22, [#allocation4], %s1605_s7, %s1605_s7, %s1606_s8  }
  0x13   :  { %s1607_s11 = smov [#allocation6]   ;;  %s1554_s15 = scalar_lea.hbm %s1933_s4, 1024 }
  0x14   :  { %s37_s12 = sshll.u32 %s1607_s11, 4  ;;  %p1555_p8 = scmp.ne.s32.totalorder %s1933_s4, %s1554_s15  ;;  %s38_s12 = int_to_ptr.vmem [resolvable:$true] %s37_s12 }
  0x15   :  { %p1558_p9 = scmp.lt.u32.totalorder %s1554_s15, %s1933_s4 }
  0x17   :  { %p1560_p10 = pnand %p1558_p9, %p1555_p8 }
  0x19   :  { %1563 = shalt.err (!%p1560_p10)
}
  0x1a   :  { %s1564_s20 = scalar_lea.vmem %s38_s12, 1024  ;;  %p1569_p12 = scmp.lt.s32.totalorder %s38_s12, %s38_s12 }
  0x1b   :  { %p1565_p11 = scmp.ne.s32.totalorder %s38_s12, %s1564_s20  ;;  %p1570_p13 = scmp.lt.s32.totalorder %s1564_s20, %s1564_s20 }
  0x1d   :  { %p1571_p0 = por %p1570_p13, %p1569_p12 }
  0x1f   :  { %p1572_p1 = pnand %p1571_p0, %p1565_p11 }
  0x21   :  { %1575 = shalt.err (!%p1572_p1)
}
  0x22   :  { %s1608_s2 = smov 128   ;;  %s1609_s21 = smov 8  }
  0x23   :  { %43 = dma.hbm_to_vmem [thread:$0]  %s1933_s4, 1024, %s38_s12, [#allocation7], %s1608_s2, %s1608_s2, %s1609_s21  }
  0x24   :  { %1598 = dma.done.wait [#allocation4], 2048  }
  0x25   :  { %1599 = vsyncadd [#allocation4], 4294965248 }
  0x26   :  { %1600 = dma.done.wait [#allocation7], 1024  }
  0x27   :  { %1601 = vsyncadd [#allocation7], 4294966272  ;;  %v1610_v0 = vmov 0.0   ;;  %vm105_vm0 = vcmask 1043456   ;;  %v61_v1 = vld [vmem:[%s1930_s1 + $0x8] sm:$0xff]  ;;  %v63_v2 = vld [vmem:[%s1930_s1 + $0x18] sm:$0xff]  ;;  %v70_v50 = vlaneseq }
  0x28   :  { %176 = vmatprep.mubr.f32.mxu1 %v1610_v0  ;;  %636 = vmatprep.mubr.f32.mxu0 %v1610_v0  ;;  %v60_v3 = vld [vmem:[%s1930_s1] sm:$0xff]  ;;  %v1258_v4 = vpack.c.bf16 %v63_v2, %v61_v1  ;;  %v62_v5 = vld [vmem:[%s1930_s1 + $0x10] sm:$0xff]  ;;  %v65_v6 = vld [vmem:[%s1930_s1 + $0x28] sm:$0xff]  ;;  %vm1611_vm1 = vmmov 1   ;;  %vm80_vm3 = vcmask 228352   ;;  %vm259_vm4 = vcmask 523264  }
  0x29   :  { %v67_v7 = vld [vmem:[%s1930_s1 + $0x38] sm:$0xf]  ;;  %v1260_v8 = vpack.c.bf16 %v62_v5, %v60_v3  ;;  %vm1695_vm2 = vmpackc.low %vm105_vm0, %vm1611_vm1  ;;  %v64_v11 = vld [vmem:[%s1930_s1 + $0x20] sm:$0xff]  ;;  %v71_v53 = vshrl.u32 %v70_v50, 7  ;;  %vm1614_vm5 = vmmov 0   ;;  %s1615_s7 = smov [#allocation8]  }
  0x2a   :  { %v1262_v9 = vpack.c.bf16 %v67_v7, %v65_v6  ;;  %v66_v12 = vld [vmem:[%s1930_s1 + $0x30] sm:$0xf]  ;;  %1259 = vmatprep.subr.bf16.mxu1 %v1258_v4  ;;  %v242_v13 = vld [vmem:[#allocation3 + $0x8] sm:$0xff]  ;;  %v244_v14 = vld [vmem:[#allocation3 + $0x18] sm:$0xff]  ;;  %s1177_s8 = sshll.u32 %s1615_s7, 4  ;;  %s1178_s8 = int_to_ptr.vmem [resolvable:$true] %s1177_s8 }
  0x2b   :  { %v241_v15 = vld [vmem:[#allocation3] sm:$0xff]  ;;  %1261 = vmatpush1.bf16.msra.mxu1 %v1260_v8  ;;  %v1265_v16 = vpack.c.bf16 %v66_v12, %v64_v11  ;;  %v1705_v17 = vpack.c.bf16 %v244_v14, %v242_v13  ;;  %v243_v18 = vld [vmem:[#allocation3 + $0x10] sm:$0xff]  ;;  %v246_v20 = vld [vmem:[#allocation3 + $0x28] sm:$0xff]  ;;  %v72_v56 = vsub.s32 0, %v71_v53  ;;  %v76_v58 = vsub.s32 1, %v71_v53  ;;  %s1576_s9 = scalar_lea.vmem %s1178_s8, 128  ;;  %p1581_p3 = scmp.lt.s32.totalorder %s1178_s8, %s1178_s8 }
  0x2c   :  { %1264 = vmatprep.subr.msk.bf16.mxu1 %vm1695_vm2, %v1262_v9  ;;  %v1709_v19 = vpack.c.bf16 %v243_v18, %v241_v15  ;;  %v248_v21 = vld [vmem:[#allocation3 + $0x38] sm:$0xff]  ;;  %v245_v23 = vld [vmem:[#allocation3 + $0x20] sm:$0xff]  ;;  %v247_v24 = vld [vmem:[#allocation3 + $0x30] sm:$0xff]  ;;  %p1577_p2 = scmp.ne.s32.totalorder %s1178_s8, %s1576_s9  ;;  %p1582_p4 = scmp.lt.s32.totalorder %s1576_s9, %s1576_s9 }
  0x2d   :  { %v1711_v22 = vpack.c.bf16 %v248_v21, %v246_v20  ;;  %1317 = vmatprep.subr.bf16.mxu0 %v1705_v17  ;;  %v52_v25 = vld [vmem:[%s1929_s0] sm:$0xff]  ;;  %v250_v26 = vld [vmem:[#allocation3 + $0x48] sm:$0xff]  ;;  %v252_v27 = vld [vmem:[#allocation3 + $0x58] sm:$0xff]  ;;  %v1722_v28 = vpack.c.bf16 %v247_v24, %v245_v23 }
  0x2e   :  { %1319 = vmatpush1.bf16.msra.mxu0 %v1709_v19  ;;  %v249_v29 = vld [vmem:[#allocation3 + $0x40] sm:$0xff]  ;;  %v251_v30 = vld [vmem:[#allocation3 + $0x50] sm:$0xff]  ;;  %v1725_v31 = vpack.c.bf16 %v252_v27, %v250_v26  ;;  %v53_v32 = vld [vmem:[%s1929_s0 + $0x8] sm:$0xff]  ;;  %p1583_p5 = por %p1582_p4, %p1581_p3 }
  0x2f   :  { %1267 = vmatpush1.bf16.msk.msra.mxu1 %vm1695_vm2, %v1265_v16  ;;  %1321 = vmatprep.subr.bf16.mxu0 %v1711_v22  ;;  %v254_v33 = vld [vmem:[#allocation3 + $0x68] sm:$0xff]  ;;  %v256_v34 = vld [vmem:[#allocation3 + $0x78] sm:$0xff]  ;;  %v1734_v35 = vpack.c.bf16 %v251_v30, %v249_v29  ;;  %v253_v36 = vld [vmem:[#allocation3 + $0x60] sm:$0xff] }
  0x30   :  { %1269 = vmatprep.subr.bf16.mxu1 %v1705_v17  ;;  %v255_v37 = vld [vmem:[#allocation3 + $0x70] sm:$0xff]  ;;  %v1738_v38 = vpack.c.bf16 %v256_v34, %v254_v33  ;;  %v55_v41 = vld [vmem:[%s1929_s0 + $0x18] sm:$0xff]  ;;  %v56_v42 = vld [vmem:[%s1929_s0 + $0x20] sm:$0xff]  ;;  %p1584_p6 = pnand %p1583_p5, %p1577_p2 }
  0x31   :  { %v54_v39 = vld [vmem:[%s1929_s0 + $0x10] sm:$0xff]  ;;  %v1747_v40 = vpack.c.bf16 %v255_v37, %v253_v36  ;;  %v57_v43 = vld [vmem:[%s1929_s0 + $0x28] sm:$0xff]  ;;  %v59_v45 = vld [vmem:[%s1929_s0 + $0x38] sm:$0xff] }
  0x32   :  { %1189 = vmatmul.mubr.msk.f32.vlgmr.msra.gmra.mrb[0].mxu1 %vm80_vm3, %v52_v25  ;;  %1323 = vmatpush1.bf16.msra.mxu0 %v1722_v28  ;;  %v58_v44 = vld [vmem:[%s1929_s0 + $0x30] sm:$0xff]  ;;  %v68_v57 = vld [vmem:[%s1932_s3] sm:$0x3]  ;;  %s1612_s3 = smov 64  }
  0x33   :  { %1271 = vmatpush1.bf16.msra.mxu1 %v1709_v19  ;;  %182 = vmatprep.mubr.f32.mxu1 %v1610_v0  ;;  %v1816_v61 = vrot.slane %v68_v57, %v72_v56  ;;  %v1818_v62 = vrot.slane %v68_v57, %v76_v58 }
  0x34   :  { %1273 = vmatprep.subr.bf16.mxu1 %v1711_v22  ;;  %1325 = vmatprep.subr.bf16.mxu0 %v1725_v31 }
  0x36   :  { %1190 = vmatmul.mubr.msk.f32.gmra.mrb[2].mxu1 %vm80_vm3, %v53_v32  ;;  %1327 = vmatpush1.bf16.msra.mxu0 %v1734_v35 }
  0x37   :  { %188 = vmatprep.mubr.f32.mxu1 %v1610_v0  ;;  %1275 = vmatpush1.bf16.msra.mxu1 %v1722_v28 }
  0x38   :  { %1277 = vmatprep.subr.bf16.mxu1 %v1725_v31  ;;  %1329 = vmatprep.subr.bf16.mxu0 %v1738_v38 }
  0x3a   :  { %1191 = vmatmul.mubr.msk.f32.gmra.mrb[4].mxu1 %vm80_vm3, %v54_v39  ;;  %1331 = vmatpush1.bf16.msra.mxu0 %v1747_v40 }
  0x3b   :  { %194 = vmatprep.mubr.f32.mxu1 %v1610_v0  ;;  %1279 = vmatpush1.bf16.msra.mxu1 %v1734_v35 }
  0x3c   :  { %1281 = vmatprep.subr.bf16.mxu1 %v1738_v38  ;;  %1333 = vmatprep.subr.bf16.mxu0 %v1705_v17 }
  0x3e   :  { %1192 = vmatmul.mubr.msk.f32.gmra.mrb[6].mxu1 %vm80_vm3, %v55_v41 }
  0x3f   :  { %200 = vmatprep.mubr.f32.mxu1 %v1610_v0  ;;  %1283 = vmatpush1.bf16.msra.mxu1 %v1747_v40 }
  0x40   :  { %1285 = vmatprep.subr.bf16.mxu1 %v1705_v17 }
  0x42   :  { %1193 = vmatmul.mubr.msk.f32.gmra.mrb[8].mxu1 %vm80_vm3, %v56_v42 }
  0x43   :  { %206 = vmatprep.mubr.f32.mxu1 %v1610_v0 }
  0x46   :  { %1194 = vmatmul.mubr.msk.f32.gmra.mrb[10].mxu1 %vm80_vm3, %v57_v43 }
  0x47   :  { %212 = vmatprep.mubr.f32.mxu1 %v1610_v0 }
  0x4a   :  { %1195 = vmatmul.mubr.msk.f32.gmra.mrb[12].mxu1 %vm80_vm3, %v58_v44 }
  0x4b   :  { %218 = vmatprep.mubr.f32.mxu1 %v1610_v0 }
  0x4e   :  { %1196 = vmatmul.mubr.msk.f32.gmra.mrb[14].mxu1 %vm80_vm3, %v59_v45 }
  0x4f   :  { %327 = vmatprep.mubr.f32.mxu1 %v1610_v0 }
  0x52   :  { %328 = vmatmul.mubr.f32.vlgmr.msra.gmra.mrb[0].mxu1 %v1610_v0 }
  0x53   :  { %1287 = vmatpush1.bf16.msra.mxu1 %v1709_v19  ;;  %430 = vmatprep.mubr.f32.mxu1 %v1610_v0 }
  0x54   :  { %1289 = vmatprep.subr.bf16.mxu1 %v1711_v22 }
  0x57   :  { %1291 = vmatpush1.bf16.msra.mxu1 %v1722_v28 }
  0x58   :  { %1293 = vmatprep.subr.bf16.mxu1 %v1725_v31 }
  0x5b   :  { %1295 = vmatpush1.bf16.msra.mxu1 %v1734_v35 }
  0x5c   :  { %1297 = vmatprep.subr.bf16.mxu1 %v1738_v38 }
  0x5f   :  { %1299 = vmatpush1.bf16.msra.mxu1 %v1747_v40 }
  0x60   :  { %1301 = vmatprep.subr.bf16.mxu1 %v1705_v17 }
 0x111   :  { %v1793_v46 = vpop.f32.mrb[6].mxu1 }
 0x112   :  { %v1795_v47 = vpop.f32.mrb[7].mxu1 }
 0x115   :  { %v1797_v48 = vpop.f32.mrb[8].mxu1 }
 0x116   :  { %v1799_v49 = vpop.f32.mrb[9].mxu1 }
 0x119   :  { %v1801_v51 = vpop.f32.mrb[10].mxu1 }
 0x11a   :  { %v1803_v52 = vpop.f32.mrb[11].mxu1 }
 0x11d   :  { %v1805_v54 = vpop.f32.mrb[12].mxu1 }
 0x11e   :  { %v1807_v55 = vpop.f32.mrb[13].mxu1 }
 0x121   :  { %v1812_v59 = vpop.f32.mrb[14].mxu1 }
 0x122   :  { %v1814_v60 = vpop.f32.mrb[15].mxu1 }
 0x125   :  { %v329_v63 = vpop.f32.mrb[0].mxu1 }
 0x126   :  { %v1408_v1 = vadd.f32 %v329_v63, %v1816_v61  ;;  %v331_v2 = vpop.f32.mrb[1].mxu1 }
 0x127   :  { %v1409_v3 = vadd.f32 %v331_v2, %v1818_v62 }
 0x128   :  { %v1197_v4 = vmul.f32 -1.442695, %v1408_v1 }
 0x129   :  { %v1198_v5 = vmul.f32 -1.442695, %v1409_v3 }
 0x12a   :  { %1452 = vpow2.f32 %v1197_v4 }
 0x12b   :  { %1454 = vpow2.f32 %v1198_v5 }
 0x134   :  { %v1453_v6 = vpop.eup %1452 }
 0x135   :  { %v1455_v7 = vpop.eup %1454  ;;  %v342_v9 = vadd.f32 1.0, %v1453_v6 }
 0x136   :  { %v343_v8 = vadd.f32 1.0, %v1455_v7 }
 0x138   :  { %1456 = vrcp.f32 %v343_v8 }
 0x139   :  { %1458 = vrcp.f32 %v342_v9 }
 0x142   :  { %v1457_v10 = vpop.eup %1456 }
 0x143   :  { %v348_v11 = vmul.f32 2.0, %v1457_v10  ;;  %v1459_v13 = vpop.eup %1458 }
 0x144   :  { %v350_v15 = vmul.f32 0.0, %v1459_v13 }
 0x145   :  { %v1199_v12 = vadd.f32 -1.0, %v348_v11 }
 0x147   :  { %v351_v14 = vmul.f32 %v1459_v13, %v1199_v12 }
 0x149   :  { %353 = vrot.lane.b32.xlu0 %v351_v14, %s1612_s3 }
 0x1bb   :  { %v354_v16 = vpop.permute.xlu0 %353 }
 0x1bc   :  { %v356_v18 = vadd.f32 %v354_v16, %v350_v15 }
 0x1be   :  { %1460 = vtanh.f32 %v356_v18 }
 0x1c8   :  { %v1461_v20 = vpop.eup %1460 }
 0x1c9   :  { %v358_v21 = vmul.f32 %v1461_v20, %v1457_v10 }
 0x1cb   :  { %362 = vrot.lane.b32.xlu0 %v358_v21, %s1612_s3 }
 0x23d   :  { %v363_v23 = vpop.permute.xlu0 %362 }
 0x23e   :  { %1200 = vmatmul.mubr.msk.f32.vlgmr.msra.gmra.mrb[2].mxu1 %vm259_vm4, %v363_v23  ;;  %v197_v23 = vadd.f32 %v1793_v46, %v1816_v61 }
 0x23f   :  { %1303 = vmatpush1.bf16.msra.mxu1 %v1709_v19  ;;  %533 = vmatprep.mubr.f32.mxu1 %v1610_v0 }
 0x240   :  { %1305 = vmatprep.subr.bf16.mxu1 %v1711_v22 }
 0x243   :  { %1307 = vmatpush1.bf16.msra.mxu1 %v1722_v28 }
 0x244   :  { %1309 = vmatprep.subr.bf16.mxu1 %v1725_v31 }
 0x247   :  { %1311 = vmatpush1.bf16.msra.mxu1 %v1734_v35 }
 0x248   :  { %1313 = vmatprep.subr.bf16.mxu1 %v1738_v38 }
 0x24b   :  { %1315 = vmatpush1.bf16.msra.mxu1 %v1747_v40 }
 0x311   :  { %v432_v24 = vpop.f32.mrb[2].mxu1 }
 0x312   :  { %v1410_v25 = vadd.f32 %v432_v24, %v1816_v61  ;;  %v434_v26 = vpop.f32.mrb[3].mxu1  ;;  %v199_v24 = vadd.f32 %v1795_v47, %v1818_v62 }
 0x313   :  { %v1411_v27 = vadd.f32 %v434_v26, %v1818_v62 }
 0x314   :  { %v1201_v29 = vmul.f32 -1.442695, %v1410_v25 }
 0x315   :  { %v1202_v30 = vmul.f32 -1.442695, %v1411_v27 }
 0x316   :  { %1462 = vpow2.f32 %v1201_v29 }
 0x317   :  { %1464 = vpow2.f32 %v1202_v30 }
 0x320   :  { %v1463_v32 = vpop.eup %1462 }
 0x321   :  { %v1465_v33 = vpop.eup %1464  ;;  %v445_v36 = vadd.f32 1.0, %v1463_v32 }
 0x322   :  { %v446_v34 = vadd.f32 1.0, %v1465_v33 }
 0x324   :  { %1466 = vrcp.f32 %v446_v34 }
 0x325   :  { %1468 = vrcp.f32 %v445_v36 }
 0x32e   :  { %v1467_v37 = vpop.eup %1466 }
 0x32f   :  { %v451_v39 = vmul.f32 2.0, %v1467_v37  ;;  %v1469_v42 = vpop.eup %1468 }
 0x330   :  { %v453_v44 = vmul.f32 %v1469_v42, %v356_v18 }
 0x331   :  { %v1203_v41 = vadd.f32 -1.0, %v451_v39 }
 0x333   :  { %v454_v43 = vmul.f32 %v1469_v42, %v1203_v41 }
 0x335   :  { %456 = vrot.lane.b32.xlu1 %v454_v43, %s1612_s3 }
 0x3a7   :  { %v457_v45 = vpop.permute.xlu1 %456 }
 0x3a8   :  { %v459_v50 = vadd.f32 %v457_v45, %v453_v44 }
 0x3aa   :  { %1470 = vtanh.f32 %v459_v50 }
 0x3b4   :  { %v1471_v53 = vpop.eup %1470 }
 0x3b5   :  { %v461_v56 = vmul.f32 %v1471_v53, %v1467_v37 }
 0x3b7   :  { %465 = vrot.lane.b32.xlu1 %v461_v56, %s1612_s3 }
 0x429   :  { %v466_v57 = vpop.permute.xlu1 %465 }
 0x42a   :  { %1204 = vmatmul.mubr.msk.f32.vlgmr.msra.gmra.mrb[4].mxu1 %vm259_vm4, %v466_v57  ;;  %v203_v57 = vadd.f32 %v1797_v48, %v1816_v61 }
 0x42b   :  { %1255 = vmatprep.mubr.msk.f32.mxu1 %vm1614_vm5, %v1610_v0 }
 0x4fd   :  { %v535_v58 = vpop.f32.mrb[4].mxu1 }
 0x4fe   :  { %v1412_v63 = vadd.f32 %v535_v58, %v1816_v61  ;;  %v537_v1 = vpop.f32.mrb[5].mxu1  ;;  %v205_v58 = vadd.f32 %v1799_v49, %v1818_v62 }
 0x4ff   :  { %v1413_v2 = vadd.f32 %v537_v1, %v1818_v62 }
 0x500   :  { %v1205_v3 = vmul.f32 -1.442695, %v1412_v63 }
 0x501   :  { %v1206_v4 = vmul.f32 -1.442695, %v1413_v2 }
 0x502   :  { %1472 = vpow2.f32 %v1205_v3 }
 0x503   :  { %1474 = vpow2.f32 %v1206_v4 }
 0x50c   :  { %v1473_v5 = vpop.eup %1472 }
 0x50d   :  { %v1475_v6 = vpop.eup %1474  ;;  %v548_v8 = vadd.f32 1.0, %v1473_v5 }
 0x50e   :  { %v549_v7 = vadd.f32 1.0, %v1475_v6 }
 0x510   :  { %1476 = vrcp.f32 %v549_v7 }
 0x511   :  { %1478 = vrcp.f32 %v548_v8 }
 0x51a   :  { %v1477_v9 = vpop.eup %1476 }
 0x51b   :  { %v554_v10 = vmul.f32 2.0, %v1477_v9  ;;  %v1479_v12 = vpop.eup %1478 }
 0x51c   :  { %v556_v14 = vmul.f32 %v1479_v12, %v459_v50 }
 0x51d   :  { %v1207_v11 = vadd.f32 -1.0, %v554_v10 }
 0x51f   :  { %v557_v13 = vmul.f32 %v1479_v12, %v1207_v11 }
 0x521   :  { %559 = vrot.lane.b32.xlu0 %v557_v13, %s1612_s3 }
 0x593   :  { %v560_v15 = vpop.permute.xlu0 %559 }
 0x594   :  { %v562_v16 = vadd.f32 %v560_v15, %v556_v14 }
 0x596   :  { %1480 = vtanh.f32 %v562_v16 }
 0x5a0   :  { %v1481_v18 = vpop.eup %1480 }
 0x5a1   :  { %v564_v20 = vmul.f32 %v1481_v18, %v1477_v9 }
 0x5a3   :  { %568 = vrot.lane.b32.xlu1 %v564_v20, %s1612_s3 }
 0x615   :  { %v569_v21 = vpop.permute.xlu1 %568 }
 0x616   :  { %1208 = vmatmul.mubr.msk.f32.vlgmr.msra.gmra.mrb[0].mxu0 %vm259_vm4, %v569_v21  ;;  %v209_v21 = vadd.f32 %v1801_v51, %v1816_v61 }
 0x617   :  { %1335 = vmatpush1.bf16.msra.mxu0 %v1709_v19  ;;  %739 = vmatprep.mubr.f32.mxu0 %v1610_v0 }
 0x618   :  { %1337 = vmatprep.subr.bf16.mxu0 %v1711_v22 }
 0x61b   :  { %1339 = vmatpush1.bf16.msra.mxu0 %v1722_v28 }
 0x61c   :  { %1341 = vmatprep.subr.bf16.mxu0 %v1725_v31 }
 0x61f   :  { %1343 = vmatpush1.bf16.msra.mxu0 %v1734_v35 }
 0x620   :  { %1345 = vmatprep.subr.bf16.mxu0 %v1738_v38 }
 0x623   :  { %1347 = vmatpush1.bf16.msra.mxu0 %v1747_v40 }
 0x624   :  { %1349 = vmatprep.subr.bf16.mxu0 %v1705_v17 }
 0x6e9   :  { %v638_v25 = vpop.f32.mrb[0].mxu0 }
 0x6ea   :  { %v643_v26 = vadd.f32 %v638_v25, %v197_v23  ;;  %v640_v27 = vpop.f32.mrb[1].mxu0  ;;  %v211_v23 = vadd.f32 %v1803_v52, %v1818_v62 }
 0x6eb   :  { %v644_v29 = vadd.f32 %v640_v27, %v199_v24 }
 0x6ec   :  { %v1209_v30 = vmul.f32 -1.442695, %v643_v26 }
 0x6ed   :  { %v1210_v32 = vmul.f32 -1.442695, %v644_v29 }
 0x6ee   :  { %1482 = vpow2.f32 %v1209_v30 }
 0x6ef   :  { %1484 = vpow2.f32 %v1210_v32 }
 0x6f8   :  { %v1483_v33 = vpop.eup %1482 }
 0x6f9   :  { %v1485_v34 = vpop.eup %1484  ;;  %v651_v37 = vadd.f32 1.0, %v1483_v33 }
 0x6fa   :  { %v652_v36 = vadd.f32 1.0, %v1485_v34 }
 0x6fc   :  { %1486 = vrcp.f32 %v652_v36 }
 0x6fd   :  { %1488 = vrcp.f32 %v651_v37 }
 0x706   :  { %v1487_v39 = vpop.eup %1486 }
 0x707   :  { %v657_v41 = vmul.f32 2.0, %v1487_v39  ;;  %v1489_v42 = vpop.eup %1488 }
 0x708   :  { %v659_v47 = vmul.f32 %v1489_v42, %v562_v16 }
 0x709   :  { %v1211_v46 = vadd.f32 -1.0, %v657_v41 }
 0x70b   :  { %v660_v43 = vmul.f32 %v1489_v42, %v1211_v46 }
 0x70d   :  { %662 = vrot.lane.b32.xlu0 %v660_v43, %s1612_s3 }
 0x77f   :  { %v663_v44 = vpop.permute.xlu0 %662 }
 0x780   :  { %v665_v45 = vadd.f32 %v663_v44, %v659_v47 }
 0x782   :  { %1490 = vtanh.f32 %v665_v45 }
 0x78c   :  { %v1491_v50 = vpop.eup %1490 }
 0x78d   :  { %v667_v53 = vmul.f32 %v1491_v50, %v1487_v39 }
 0x78f   :  { %671 = vrot.lane.b32.xlu1 %v667_v53, %s1612_s3 }
 0x801   :  { %v672_v56 = vpop.permute.xlu1 %671 }
 0x802   :  { %1212 = vmatmul.mubr.msk.f32.vlgmr.msra.gmra.mrb[2].mxu0 %vm259_vm4, %v672_v56 }
 0x803   :  { %1351 = vmatpush1.bf16.msra.mxu0 %v1709_v19  ;;  %842 = vmatprep.mubr.f32.mxu0 %v1610_v0 }
 0x804   :  { %1353 = vmatprep.subr.bf16.mxu0 %v1711_v22 }
 0x807   :  { %1355 = vmatpush1.bf16.msra.mxu0 %v1722_v28 }
 0x808   :  { %1357 = vmatprep.subr.bf16.mxu0 %v1725_v31 }
 0x80b   :  { %1359 = vmatpush1.bf16.msra.mxu0 %v1734_v35 }
 0x80c   :  { %1361 = vmatprep.subr.bf16.mxu0 %v1738_v38 }
 0x80f   :  { %1363 = vmatpush1.bf16.msra.mxu0 %v1747_v40 }
 0x810   :  { %1365 = vmatprep.subr.bf16.mxu0 %v1705_v17 }
 0x8d5   :  { %v741_v63 = vpop.f32.mrb[2].mxu0 }
 0x8d6   :  { %v746_v1 = vadd.f32 %v741_v63, %v203_v57  ;;  %v743_v2 = vpop.f32.mrb[3].mxu0 }
 0x8d7   :  { %v747_v3 = vadd.f32 %v743_v2, %v205_v58 }
 0x8d8   :  { %v1213_v4 = vmul.f32 -1.442695, %v746_v1 }
 0x8d9   :  { %v1214_v5 = vmul.f32 -1.442695, %v747_v3 }
 0x8da   :  { %1492 = vpow2.f32 %v1213_v4 }
 0x8db   :  { %1494 = vpow2.f32 %v1214_v5 }
 0x8e4   :  { %v1493_v6 = vpop.eup %1492 }
 0x8e5   :  { %v1495_v7 = vpop.eup %1494  ;;  %v754_v9 = vadd.f32 1.0, %v1493_v6 }
 0x8e6   :  { %v755_v8 = vadd.f32 1.0, %v1495_v7 }
 0x8e8   :  { %1496 = vrcp.f32 %v755_v8  ;;  %v221_v8 = vadd.f32 %v1812_v59, %v1816_v61 }
 0x8e9   :  { %1498 = vrcp.f32 %v754_v9  ;;  %v223_v9 = vadd.f32 %v1814_v60, %v1818_v62  ;;  %v1080_v60 = vld [vmem:[#allocation6] sm:$0xff] }
 0x8f2   :  { %v1497_v10 = vpop.eup %1496 }
 0x8f3   :  { %v760_v11 = vmul.f32 2.0, %v1497_v10  ;;  %v1499_v12 = vpop.eup %1498 }
 0x8f4   :  { %v762_v49 = vmul.f32 %v1499_v12, %v665_v45  ;;  %v215_v45 = vadd.f32 %v1805_v54, %v1816_v61 }
 0x8f5   :  { %v1215_v48 = vadd.f32 -1.0, %v760_v11 }
 0x8f7   :  { %v763_v13 = vmul.f32 %v1499_v12, %v1215_v48 }
 0x8f9   :  { %765 = vrot.lane.b32.xlu0 %v763_v13, %s1612_s3 }
 0x96b   :  { %v766_v14 = vpop.permute.xlu0 %765 }
 0x96c   :  { %v768_v15 = vadd.f32 %v766_v14, %v762_v49 }
 0x96e   :  { %1500 = vtanh.f32 %v768_v15 }
 0x978   :  { %v1501_v16 = vpop.eup %1500 }
 0x979   :  { %v770_v18 = vmul.f32 %v1501_v16, %v1497_v10 }
 0x97b   :  { %774 = vrot.lane.b32.xlu1 %v770_v18, %s1612_s3 }
 0x9ed   :  { %v775_v20 = vpop.permute.xlu1 %774 }
 0x9ee   :  { %1216 = vmatmul.mubr.msk.f32.vlgmr.msra.gmra.mrb[4].mxu0 %vm259_vm4, %v775_v20 }
 0x9ef   :  { %1367 = vmatpush1.bf16.msra.mxu0 %v1709_v19  ;;  %945 = vmatprep.mubr.f32.mxu0 %v1610_v0 }
 0x9f0   :  { %1369 = vmatprep.subr.bf16.mxu0 %v1711_v22 }
 0x9f3   :  { %1371 = vmatpush1.bf16.msra.mxu0 %v1722_v28 }
 0x9f4   :  { %1373 = vmatprep.subr.bf16.mxu0 %v1725_v31 }
 0x9f7   :  { %1375 = vmatpush1.bf16.msra.mxu0 %v1734_v35 }
 0x9f8   :  { %1377 = vmatprep.subr.bf16.mxu0 %v1738_v38 }
 0x9fb   :  { %1379 = vmatpush1.bf16.msra.mxu0 %v1747_v40 }
 0x9fc   :  { %1381 = vmatprep.subr.bf16.mxu0 %v1705_v17 }
 0xac1   :  { %v844_v24 = vpop.f32.mrb[4].mxu0 }
 0xac2   :  { %v849_v25 = vadd.f32 %v844_v24, %v209_v21  ;;  %v846_v26 = vpop.f32.mrb[5].mxu0  ;;  %v1082_v24 = vld [vmem:[#allocation6 + $0x10] sm:$0xff] }
 0xac3   :  { %v850_v27 = vadd.f32 %v846_v26, %v211_v23 }
 0xac4   :  { %v1217_v29 = vmul.f32 -1.442695, %v849_v25  ;;  %v1613_v25 = vmov 0.0|0.0  }
 0xac5   :  { %v1218_v30 = vmul.f32 -1.442695, %v850_v27  ;;  %1396 = vmatprep.subr.bf16.mxu1 %v1613_v25  ;;  %v1083_v27 = vld [vmem:[#allocation6 + $0x18] sm:$0xff] }
 0xac6   :  { %1502 = vpow2.f32 %v1217_v29  ;;  %v1400_v29 = vpack.c.bf16 %v1083_v27, %v1082_v24 }
 0xac7   :  { %1504 = vpow2.f32 %v1218_v30  ;;  %v1084_v30 = vld [vmem:[#allocation6 + $0x20] sm:$0xff] }
 0xad0   :  { %v1503_v32 = vpop.eup %1502 }
 0xad1   :  { %v1505_v33 = vpop.eup %1504  ;;  %v857_v36 = vadd.f32 1.0, %v1503_v32  ;;  %v1085_v32 = vld [vmem:[#allocation6 + $0x28] sm:$0xff] }
 0xad2   :  { %v858_v34 = vadd.f32 1.0, %v1505_v33  ;;  %v1403_v33 = vpack.c.bf16 %v1085_v32, %v1084_v30 }
 0xad4   :  { %1506 = vrcp.f32 %v858_v34  ;;  %v1086_v34 = vld [vmem:[#allocation6 + $0x30] sm:$0xff] }
 0xad5   :  { %1508 = vrcp.f32 %v857_v36  ;;  %v1087_v36 = vld [vmem:[#allocation6 + $0x38] sm:$0xff] }
 0xade   :  { %v1507_v17 = vpop.eup %1506 }
 0xadf   :  { %v863_v37 = vmul.f32 2.0, %v1507_v17  ;;  %v1509_v39 = vpop.eup %1508 }
 0xae0   :  { %v865_v52 = vmul.f32 %v1509_v39, %v768_v15 }
 0xae1   :  { %v1219_v51 = vadd.f32 -1.0, %v863_v37 }
 0xae3   :  { %v866_v41 = vmul.f32 %v1509_v39, %v1219_v51 }
 0xae5   :  { %868 = vrot.lane.b32.xlu0 %v866_v41, %s1612_s3 }
 0xb57   :  { %v869_v46 = vpop.permute.xlu0 %868 }
 0xb58   :  { %v871_v42 = vadd.f32 %v869_v46, %v865_v52  ;;  %v1228_v46 = vld [vmem:[%s1934_s5] ss:$0 sm:$0xff] }
 0xb5a   :  { %1510 = vtanh.f32 %v871_v42 }
 0xb64   :  { %v1511_v43 = vpop.eup %1510 }
 0xb65   :  { %v873_v47 = vmul.f32 %v1511_v43, %v1507_v17  ;;  %v1406_v17 = vpack.c.bf16 %v1087_v36, %v1086_v34 }
 0xb67   :  { %877 = vrot.lane.b32.xlu1 %v873_v47, %s1612_s3 }
 0xbd9   :  { %v878_v44 = vpop.permute.xlu1 %877 }
 0xbda   :  { %1220 = vmatmul.mubr.msk.f32.vlgmr.msra.gmra.mrb[6].mxu0 %vm259_vm4, %v878_v44 }
 0xbdb   :  { %1383 = vmatpush1.bf16.msra.mxu0 %v1709_v19  ;;  %1048 = vmatprep.mubr.f32.mxu0 %v1610_v0  ;;  %v217_v19 = vadd.f32 %v1807_v55, %v1818_v62  ;;  %v1081_v62 = vld [vmem:[#allocation6 + $0x8] sm:$0xff] }
 0xbdc   :  { %1385 = vmatprep.subr.bf16.mxu0 %v1711_v22  ;;  %v1397_v26 = vpack.c.bf16 %v1081_v62, %v1080_v60 }
 0xbde   :  { %1398 = vmatpush3.bf16.msra.mxu1 %v1397_v26 }
 0xbdf   :  { %1387 = vmatpush1.bf16.msra.mxu0 %v1722_v28  ;;  %1399 = vmatprep.subr.bf16.mxu1 %v1613_v25 }
 0xbe0   :  { %1389 = vmatprep.subr.bf16.mxu0 %v1725_v31 }
 0xbe2   :  { %1401 = vmatpush3.bf16.msra.mxu1 %v1400_v29 }
 0xbe3   :  { %1391 = vmatpush1.bf16.msra.mxu0 %v1734_v35  ;;  %1402 = vmatprep.subr.bf16.mxu1 %v1613_v25 }
 0xbe4   :  { %1393 = vmatprep.subr.bf16.mxu0 %v1738_v38 }
 0xbe6   :  { %1404 = vmatpush3.bf16.msra.mxu1 %v1403_v33 }
 0xbe7   :  { %1395 = vmatpush1.bf16.msra.mxu0 %v1747_v40  ;;  %1405 = vmatprep.subr.bf16.mxu1 %v1613_v25 }
 0xbea   :  { %1407 = vmatpush3.bf16.msra.mxu1 %v1406_v17 }
 0xcad   :  { %v947_v50 = vpop.f32.mrb[6].mxu0 }
 0xcae   :  { %v952_v53 = vadd.f32 %v947_v50, %v215_v45  ;;  %v949_v56 = vpop.f32.mrb[7].mxu0 }
 0xcaf   :  { %v953_v22 = vadd.f32 %v949_v56, %v217_v19 }
 0xcb0   :  { %v1221_v57 = vmul.f32 -1.442695, %v952_v53 }
 0xcb1   :  { %v1222_v28 = vmul.f32 -1.442695, %v953_v22 }
 0xcb2   :  { %1512 = vpow2.f32 %v1221_v57 }
 0xcb3   :  { %1514 = vpow2.f32 %v1222_v28 }
 0xcbc   :  { %v1513_v31 = vpop.eup %1512 }
 0xcbd   :  { %v1515_v35 = vpop.eup %1514  ;;  %v960_v38 = vadd.f32 1.0, %v1513_v31 }
 0xcbe   :  { %v961_v58 = vadd.f32 1.0, %v1515_v35 }
 0xcc0   :  { %1516 = vrcp.f32 %v961_v58 }
 0xcc1   :  { %1518 = vrcp.f32 %v960_v38 }
 0xcca   :  { %v1517_v40 = vpop.eup %1516 }
 0xccb   :  { %v966_v63 = vmul.f32 2.0, %v1517_v40  ;;  %v1519_v1 = vpop.eup %1518 }
 0xccc   :  { %v968_v55 = vmul.f32 %v1519_v1, %v871_v42 }
 0xccd   :  { %v1223_v54 = vadd.f32 -1.0, %v966_v63 }
 0xccf   :  { %v969_v2 = vmul.f32 %v1519_v1, %v1223_v54 }
 0xcd1   :  { %971 = vrot.lane.b32.xlu0 %v969_v2, %s1612_s3 }
 0xd43   :  { %v972_v3 = vpop.permute.xlu0 %971 }
 0xd44   :  { %v974_v4 = vadd.f32 %v972_v3, %v968_v55 }
 0xd46   :  { %1520 = vtanh.f32 %v974_v4 }
 0xd50   :  { %v1521_v5 = vpop.eup %1520 }
 0xd51   :  { %v976_v6 = vmul.f32 %v1521_v5, %v1517_v40 }
 0xd53   :  { %980 = vrot.lane.b32.xlu1 %v976_v6, %s1612_s3 }
 0xdc5   :  { %v981_v7 = vpop.permute.xlu1 %980 }
 0xdc6   :  { %1224 = vmatmul.mubr.msk.f32.vlgmr.msra.gmra.mrb[8].mxu0 %vm259_vm4, %v981_v7 }
 0xe99   :  { %v1050_v10 = vpop.f32.mrb[8].mxu0 }
 0xe9a   :  { %v1055_v11 = vadd.f32 %v1050_v10, %v221_v8  ;;  %v1052_v48 = vpop.f32.mrb[9].mxu0 }
 0xe9b   :  { %v1056_v12 = vadd.f32 %v1052_v48, %v223_v9 }
 0xe9c   :  { %v1225_v13 = vmul.f32 -1.442695, %v1055_v11 }
 0xe9d   :  { %v1226_v49 = vmul.f32 -1.442695, %v1056_v12 }
 0xe9e   :  { %1522 = vpow2.f32 %v1225_v13 }
 0xe9f   :  { %1524 = vpow2.f32 %v1226_v49 }
 0xea8   :  { %v1523_v14 = vpop.eup %1522 }
 0xea9   :  { %v1525_v15 = vpop.eup %1524  ;;  %v1063_v18 = vadd.f32 1.0, %v1523_v14 }
 0xeaa   :  { %v1064_v16 = vadd.f32 1.0, %v1525_v15 }
 0xeac   :  { %1526 = vrcp.f32 %v1064_v16 }
 0xead   :  { %1528 = vrcp.f32 %v1063_v18 }
 0xeb6   :  { %v1527_v20 = vpop.eup %1526 }
 0xeb7   :  { %v1069_v21 = vmul.f32 2.0, %v1527_v20  ;;  %v1529_v61 = vpop.eup %1528 }
 0xeb8   :  { %v1071_v37 = vmul.f32 %v1529_v61, %v974_v4 }
 0xeb9   :  { %v1227_v59 = vadd.f32 -1.0, %v1069_v21 }
 0xebb   :  { %v1072_v23 = vmul.f32 %v1529_v61, %v1227_v59 }
 0xebd   :  { %1074 = vrot.lane.b32.xlu0 %v1072_v23, %s1612_s3 }
 0xf2f   :  { %v1075_v51 = vpop.permute.xlu0 %1074 }
 0xf30   :  { %v1077_v39 = vadd.f32 %v1075_v51, %v1071_v37 }
 0xf32   :  { %1530 = vtanh.f32 %v1077_v39 }
 0xf3c   :  { %v1531_v41 = vpop.eup %1530 }
 0xf3d   :  { %v1079_v0 = vmul.f32 %v1531_v41, %v1527_v20 }
 0xf3f   :  { %1096 = vrot.lane.b32.xlu1 %v1079_v0, %s1612_s3 }
 0xfb1   :  { %v1097_v52 = vpop.permute.xlu1 %1096 }
 0xfb2   :  { %1256 = vmatmul.mubr.msk.f32.vlgmr.msra.gmra.mrb[16].mxu1 %vm259_vm4, %v1097_v52 }
0x1085   :  { %v1166_v42 = vpop.f32.mrb[16].mxu1 }
0x1086   :  { %v1167_v43 = vadd.f32 %v1228_v46, %v1166_v42  ;;  %v1257_v47 = vpop.f32.mrb[17].mxu1 }
0x1088   :  { %1170 = vst [vmem:[#allocation8] sm:$0xff] %v1167_v43 }
0x1089   :  { %1587 = shalt.err (!%p1584_p6)
}
0x108a   :  { %s1588_s12 = scalar_lea.hbm %s1935_s6, 128 }
0x108b   :  { %p1589_p7 = scmp.ne.s32.totalorder %s1935_s6, %s1588_s12  ;;  %p1592_p8 = scmp.lt.u32.totalorder %s1588_s12, %s1935_s6 }
0x108d   :  { %p1594_p9 = pnand %p1592_p8, %p1589_p7 }
0x108f   :  { %1597 = shalt.err (!%p1594_p9)
}
0x1090   :  { %1180 = dma.vmem_to_hbm [thread:$0]  %s1178_s8, 128, %s1935_s6, [#allocation5]  }
0x1091   :  { %1602 = dma.done.wait [#allocation5], 128  }
0x1092   :  { %1603 = vsyncadd [#allocation5], 4294967168 }
0x1093   :  { %1184 = vsyncpa [#allocation4], 1 }
0x1094   :  { %1185 = vsyncpa [#allocation7], 1 }
0x1095   :  { %1186 = vsyncpa [#allocation5], 1 }

</bundles_post_ra>
